<compile_context>
chip_gen: v6e
topology: v6e:2x2x1
jax: 0.10.0
libtpu: 0.0.40
codegen_flags: <defaults>
</compile_context>

<pallas_src>
import jax
import jax.numpy as jnp
from jax import lax
from jax.experimental import pallas as pl
from jax.experimental.pallas import tpu as pltpu

KH = KW = 3  # Conv2d kernel size


def conv3x3_kernel(w_ref, b_ref, x_ref, o_ref):
    # w_ref: (9,)     f32 SMEM (flattened OIHW 3x3 weights, scalar reads)
    # b_ref: (1,)     f32 SMEM
    # x_ref: (H, W)   f32 VMEM block (batch & channel dims squeezed by BlockSpec)
    # o_ref: (Ho, Wo) f32 VMEM block
    Ho, Wo = o_ref.shape

    # Hoist all nine scalar weight reads out of the tap loops.
    w = [w_ref[i] for i in range(KH * KW)]

    x = x_ref[...]  # (H, W): single small load, all taps are static slices

    # One independent accumulator chain per kernel row (kh): the row (sublane)
    # shift is computed once per kh (3 shifts, not 9), and three independent
    # chains give the VALU slots work to overlap (no f32 FMA on v5e/v6e).
    accs = []
    for kh in range(KH):
        xr = x[kh:kh + Ho, :]                        # hoisted row shift
        a = xr[:, 0:Wo] * w[kh * KW]                 # first tap: no add
        for kw in range(1, KW):
            a = a + xr[:, kw:kw + Wo] * w[kh * KW + kw]
        accs.append(a)

    # Balanced combine; bias folded into one of the adds.
    o_ref[...] = (accs[0] + b_ref[0]) + (accs[1] + accs[2])


def conv2d_1x1x3(x_nchw, weight, bias):
    """x_nchw: (N,1,H,W) f32; weight: (1,1,3,3); bias: (1,) -> (N,1,H-2,W-2)."""
    N, C, H, W = x_nchw.shape
    assert C == 1, "TestNet conv has a single input channel"
    Ho, Wo = H - (KH - 1), W - (KW - 1)

    w9 = weight.reshape(KH * KW).astype(jnp.float32)   # (9,) flat OIHW weights
    b = bias.astype(jnp.float32)                       # (1,)

    return pl.pallas_call(
        conv3x3_kernel,
        out_shape=jax.ShapeDtypeStruct((N, 1, Ho, Wo), jnp.float32),
        grid=(N,),  # batch axis; "parallel" so both v7x TensorCores get work
        in_specs=[
            pl.BlockSpec(memory_space=pltpu.MemorySpace.SMEM),   # weights (9,)
            pl.BlockSpec(memory_space=pltpu.MemorySpace.SMEM),   # bias (1,)
            # Squeeze batch & channel dims; kernel sees an (H, W) block.
            pl.BlockSpec((None, None, H, W), lambda n: (n, 0, 0, 0)),
        ],
        out_specs=pl.BlockSpec((None, None, Ho, Wo), lambda n: (n, 0, 0, 0)),
        compiler_params=pltpu.CompilerParams(
            dimension_semantics=("parallel",)),
    )(w9, b, x_nchw.astype(jnp.float32))


if __name__ == "__main__":
    key = jax.random.PRNGKey(0)
    k_x, k_w, k_b = jax.random.split(key, 3)

    # Shapes consistent with Conv2d(1, 1, 3): batch=2, C=1, 16x16 spatial.
    N, C, H, W = 2, 1, 16, 16
    x = jax.random.normal(k_x, (N, C, H, W), dtype=jnp.float32)

    # Deterministic parameters (mimic PyTorch Conv2d param shapes).
    weight = jax.random.normal(k_w, (1, 1, KH, KW), dtype=jnp.float32) * 0.1
    bias = jax.random.normal(k_b, (1,), dtype=jnp.float32) * 0.1

    out = conv2d_1x1x3(x, weight, bias)
    out = jax.block_until_ready(out)

    # Reference check against XLA's conv (same semantics as PyTorch valid conv).
    ref = lax.conv_general_dilated(
        x, weight, window_strides=(1, 1), padding="VALID",
        dimension_numbers=("NCHW", "OIHW", "NCHW")) + bias.reshape(1, 1, 1, 1)
    assert out.shape == (N, 1, H - 2, W - 2)
    assert jnp.allclose(out, ref, atol=1e-5, rtol=1e-5)

    print("KERNEL_OK")
</pallas_src>

<mosaic_0001>
module attributes {stable_mosaic.version = 11 : i64} {
  func.func @conv3x3_kernel(%arg0: i32, %arg1: memref<9xf32, #tpu.memory_space<smem>>, %arg2: memref<1xf32, #tpu.memory_space<smem>>, %arg3: memref<1x1x16x16xf32, #tpu.memory_space<vmem>>, %arg4: memref<1x1x14x14xf32, #tpu.memory_space<vmem>>) attributes {dimension_semantics = [#tpu.dimension_semantics<parallel>], iteration_bounds = array<i64: 2>, scalar_prefetch = 0 : i64, scratch_operands = 0 : i64, tpu.core_type = #tpu.core_type<tc>, window_params = [{transform_indices = @transform_0, window_bounds = array<i64: 9>}, {transform_indices = @transform_1, window_bounds = array<i64: 1>}, {transform_indices = @transform_2, window_bounds = array<i64: 1, 1, 16, 16>}, {transform_indices = @transform_3, window_bounds = array<i64: 1, 1, 14, 14>}]} {
    %c0 = arith.constant 0 : index
    %0 = memref.load %arg1[%c0] : memref<9xf32, #tpu.memory_space<smem>>
    %c1 = arith.constant 1 : index
    %1 = memref.load %arg1[%c1] : memref<9xf32, #tpu.memory_space<smem>>
    %c2 = arith.constant 2 : index
    %2 = memref.load %arg1[%c2] : memref<9xf32, #tpu.memory_space<smem>>
    %c3 = arith.constant 3 : index
    %3 = memref.load %arg1[%c3] : memref<9xf32, #tpu.memory_space<smem>>
    %c4 = arith.constant 4 : index
    %4 = memref.load %arg1[%c4] : memref<9xf32, #tpu.memory_space<smem>>
    %c5 = arith.constant 5 : index
    %5 = memref.load %arg1[%c5] : memref<9xf32, #tpu.memory_space<smem>>
    %c6 = arith.constant 6 : index
    %6 = memref.load %arg1[%c6] : memref<9xf32, #tpu.memory_space<smem>>
    %c7 = arith.constant 7 : index
    %7 = memref.load %arg1[%c7] : memref<9xf32, #tpu.memory_space<smem>>
    %c8 = arith.constant 8 : index
    %8 = memref.load %arg1[%c8] : memref<9xf32, #tpu.memory_space<smem>>
    %c0_0 = arith.constant 0 : index
    %c0_1 = arith.constant 0 : index
    %c0_2 = arith.constant 0 : index
    %c0_3 = arith.constant 0 : index
    %9 = vector.load %arg3[%c0_0, %c0_1, %c0_2, %c0_3] : memref<1x1x16x16xf32, #tpu.memory_space<vmem>>, vector<1x1x16x16xf32>
    %10 = vector.shape_cast %9 : vector<1x1x16x16xf32> to vector<16x16xf32>
    %11 = vector.extract_strided_slice %10 {offsets = [0, 0], sizes = [14, 16], strides = [1, 1]} : vector<16x16xf32> to vector<14x16xf32>
    %12 = vector.extract_strided_slice %11 {offsets = [0, 0], sizes = [14, 14], strides = [1, 1]} : vector<14x16xf32> to vector<14x14xf32>
    %13 = vector.broadcast %0 : f32 to vector<14x14xf32>
    %14 = arith.mulf %12, %13 : vector<14x14xf32>
    %15 = vector.extract_strided_slice %11 {offsets = [0, 1], sizes = [14, 14], strides = [1, 1]} : vector<14x16xf32> to vector<14x14xf32>
    %16 = vector.broadcast %1 : f32 to vector<14x14xf32>
    %17 = arith.mulf %15, %16 : vector<14x14xf32>
    %18 = arith.addf %14, %17 : vector<14x14xf32>
    %19 = vector.extract_strided_slice %11 {offsets = [0, 2], sizes = [14, 14], strides = [1, 1]} : vector<14x16xf32> to vector<14x14xf32>
    %20 = vector.broadcast %2 : f32 to vector<14x14xf32>
    %21 = arith.mulf %19, %20 : vector<14x14xf32>
    %22 = arith.addf %18, %21 : vector<14x14xf32>
    %23 = vector.extract_strided_slice %10 {offsets = [1, 0], sizes = [14, 16], strides = [1, 1]} : vector<16x16xf32> to vector<14x16xf32>
    %24 = vector.extract_strided_slice %23 {offsets = [0, 0], sizes = [14, 14], strides = [1, 1]} : vector<14x16xf32> to vector<14x14xf32>
    %25 = vector.broadcast %3 : f32 to vector<14x14xf32>
    %26 = arith.mulf %24, %25 : vector<14x14xf32>
    %27 = vector.extract_strided_slice %23 {offsets = [0, 1], sizes = [14, 14], strides = [1, 1]} : vector<14x16xf32> to vector<14x14xf32>
    %28 = vector.broadcast %4 : f32 to vector<14x14xf32>
    %29 = arith.mulf %27, %28 : vector<14x14xf32>
    %30 = arith.addf %26, %29 : vector<14x14xf32>
    %31 = vector.extract_strided_slice %23 {offsets = [0, 2], sizes = [14, 14], strides = [1, 1]} : vector<14x16xf32> to vector<14x14xf32>
    %32 = vector.broadcast %5 : f32 to vector<14x14xf32>
    %33 = arith.mulf %31, %32 : vector<14x14xf32>
    %34 = arith.addf %30, %33 : vector<14x14xf32>
    %35 = vector.extract_strided_slice %10 {offsets = [2, 0], sizes = [14, 16], strides = [1, 1]} : vector<16x16xf32> to vector<14x16xf32>
    %36 = vector.extract_strided_slice %35 {offsets = [0, 0], sizes = [14, 14], strides = [1, 1]} : vector<14x16xf32> to vector<14x14xf32>
    %37 = vector.broadcast %6 : f32 to vector<14x14xf32>
    %38 = arith.mulf %36, %37 : vector<14x14xf32>
    %39 = vector.extract_strided_slice %35 {offsets = [0, 1], sizes = [14, 14], strides = [1, 1]} : vector<14x16xf32> to vector<14x14xf32>
    %40 = vector.broadcast %7 : f32 to vector<14x14xf32>
    %41 = arith.mulf %39, %40 : vector<14x14xf32>
    %42 = arith.addf %38, %41 : vector<14x14xf32>
    %43 = vector.extract_strided_slice %35 {offsets = [0, 2], sizes = [14, 14], strides = [1, 1]} : vector<14x16xf32> to vector<14x14xf32>
    %44 = vector.broadcast %8 : f32 to vector<14x14xf32>
    %45 = arith.mulf %43, %44 : vector<14x14xf32>
    %46 = arith.addf %42, %45 : vector<14x14xf32>
    %c0_4 = arith.constant 0 : index
    %47 = memref.load %arg2[%c0_4] : memref<1xf32, #tpu.memory_space<smem>>
    %48 = vector.broadcast %47 : f32 to vector<14x14xf32>
    %49 = arith.addf %22, %48 : vector<14x14xf32>
    %50 = arith.addf %34, %46 : vector<14x14xf32>
    %51 = arith.addf %49, %50 : vector<14x14xf32>
    %c0_5 = arith.constant 0 : index
    %c0_6 = arith.constant 0 : index
    %c0_7 = arith.constant 0 : index
    %c0_8 = arith.constant 0 : index
    %52 = vector.load %arg4[%c0_5, %c0_6, %c0_7, %c0_8] : memref<1x1x14x14xf32, #tpu.memory_space<vmem>>, vector<1x1x14x14xf32>
    %53 = vector.shape_cast %52 : vector<1x1x14x14xf32> to vector<14x14xf32>
    %54 = vector.shape_cast %51 : vector<14x14xf32> to vector<1x1x14x14xf32>
    tpu.vector_store %arg4[%c0_5, %c0_6, %c0_7, %c0_8], %54 {strides = array<i32>} : memref<1x1x14x14xf32, #tpu.memory_space<vmem>>, vector<1x1x14x14xf32>,
    return
  }
  func.func @transform_0(%arg0: i32) -> i32 {
    %c0_i32 = arith.constant 0 : i32
    %c0_i32_0 = arith.constant 0 : i32
    return %c0_i32 : i32
  }
  func.func @transform_1(%arg0: i32) -> i32 {
    %c0_i32 = arith.constant 0 : i32
    %c0_i32_0 = arith.constant 0 : i32
    return %c0_i32 : i32
  }
  func.func @transform_2(%arg0: i32) -> (i32, i32, i32, i32) {
    %c0_i32 = arith.constant 0 : i32
    %c0_i32_0 = arith.constant 0 : i32
    %c0_i32_1 = arith.constant 0 : i32
    %c0_i32_2 = arith.constant 0 : i32
    return %arg0, %c0_i32, %c0_i32_0, %c0_i32_1 : i32, i32, i32, i32
  }
  func.func @transform_3(%arg0: i32) -> (i32, i32, i32, i32) {
    %c0_i32 = arith.constant 0 : i32
    %c0_i32_0 = arith.constant 0 : i32
    %c0_i32_1 = arith.constant 0 : i32
    %c0_i32_2 = arith.constant 0 : i32
    return %arg0, %c0_i32, %c0_i32_0, %c0_i32_1 : i32, i32, i32, i32
  }
}

</mosaic_0001>

<bundles_post_ra>
// kernel: tpu_custom_call.1
= control target key start
LH: loop header
LB: loop body
LE: loop exit
PB: predicated region body
PF: predicated region fallthrough
CT: control target
= control target key end

     0   :  { %s750_s0 = inlined_call_operand.vmem [shape: f32[9], index: 0, kind: input, shape index: {}]   ;;  %s751_s1 = inlined_call_operand.<no memory space> [shape: f32[1], index: 1, kind: input, shape index: {}]   ;;  %s752_s2 = inlined_call_operand.hbm [shape: f32[2,1,16,16], index: 2, kind: input, shape index: {}]   ;;  %s753_s3 = inlined_call_operand.vmem [shape: f32[2,1,14,14], index: 3, kind: output, shape index: {}]  }
   0x1   :  { %8 = sst [smem:[#allocation2]] %s751_s1 }
   0x2   :  { %9 = vsyncpa [#allocation5], 0 }
   0x3   :  { %10 = vsyncpa [#allocation4], 0 }
   0x4   :  { %12 = vsyncpa [#allocation4 + $0x1], 0  ;;  %s600_s14 = smov 0   ;;  %s602_s15 = smov 0  }
   0x5   :  { %s604_s16 = smov 0   ;;  %s606_s17 = smov 0  }
   0x6 LB: > { %s619_s1 = sadd.s32 4294967295, %s569_s17   ;;  %s622_s18 = sadd.s32 1, %s569_s17   ;;  %s569_s17 = sphi %s606_s17, %s768_s17   ;;  %s565_s16 = sphi %s604_s16, %s767_s16   ;;  %s561_s15 = sphi %s602_s15, %s766_s15   ;;  %s557_s14 = sphi %s600_s14, %s765_s14  }
   0x7   : > { %s64_s19 = ssub.s32 %s569_s17, %s622_s18  ;;  %s67_s20 = sadd.s32 1, %s565_s16 }
   0x8   : > { %p65_p0 = scmp.eq.s32.totalorder %s64_s19, 0  ;;  %p74_p1 = scmp.ne.s32.totalorder %s565_s16, %s561_s15 }
   0x9   : > { %p75_p2 = scmp.eq.s32.totalorder %s569_s17, 0  ;;  %p80_p3 = scmp.ne.s32.totalorder %s561_s15, %s557_s14 }
   0xa   : > { %s632_s21 = scalar_select %p65_p0, %s565_s16, %s67_s20  }
   0xb   : > { %p76_p4 = por %p75_p2, %p74_p1  ;;  %p756_p5 = scmp.eq.s32.totalorder %s619_s1, 0 }
   0xc   : > { %p411_p6 = scmp.ge.s32.totalorder %s569_s17, 1  ;;  %p117_p7 = scmp.lt.s32.totalorder %s569_s17, 3 }
   0xd   : > { %p639_p8 = por %p756_p5, %p80_p3  ;;  %s130_s26 = sshll.u32 %s750_s0, 4  ;;  %s131_s26 = int_to_ptr.vmem [resolvable:$true] %s130_s26 }
   0xe   : > { %p643_p9 = pnand %p411_p6, %p117_p7  ;;  %p449_p11 = scmp.lt.s32.totalorder %s569_s17, 2 }
   0xf   : > { %s757_s22 = scalar_select %p639_p8, 1, 0 }
  0x10   : > { %s758_s23 = scalar_select %p643_p9, 1, 0 }
  0x11   : > { %p440_p10 = pneg %p643_p9  ;;  %s144_s27 = sand.u32 1, %s565_s16  }
  0x12   : > { %p660_p13 = pnand %p449_p11, %p76_p4  ;;  %s414_s30 = sshll.u32 %s144_s27, 4 }
  0x13   : > { %p656_p12 = pnand %p440_p10, %p756_p5  ;;  %s488_s4 = scalar_lea.vmem %s131_s26, 16 }
  0x14   : > { %p489_p0 = scmp.ne.s32.totalorder %s131_s26, %s488_s4  ;;  %p496_p6 = scmp.lt.s32.totalorder %s131_s26, %s131_s26 }
  0x15   : > { %p490_p1 = pneg %p656_p12  ;;  %p497_p7 = scmp.lt.s32.totalorder %s488_s4, %s488_s4 }
  0x17   : > { %p491_p2 = pnand %p490_p1, %p489_p0  ;;  %p498_p8 = por %p497_p7, %p496_p6 }
  0x19   : > { %p492_p3 = pneg %p491_p2 }
  0x1b   : > { %p499_p9 = pnand %p498_p8, %p492_p3 }
  0x1d   : > { %502 = shalt.err (!%p499_p9)
}
  0x1e   : > { %s571_s5 = smov [#allocation3]   ;;  %s432_s6 = sshll.u32 %s569_s17, 8 }
  0x1f   : > { %443 = dma.vmem_to_smem (!%p656_p12), %s131_s26, 16, %s571_s5, [#allocation5]  }
  0x20   : > { %s672_s9 = scalar_lea.hbm %s752_s2, %s432_s6  ;;  %s148_s10 = scalar_lea.vmem [#allocation6], %s414_s30 }
  0x21   : > { %s155_s11 = sshll.u32 %s148_s10, 4  ;;  %s676_s12 = scalar_lea.sflag [#allocation4], %s144_s27  ;;  %s674_s11 = int_to_ptr.vmem [resolvable:$true] %s155_s11 }
  0x22   : > { %s503_s13 = scalar_lea.hbm %s672_s9, 256  ;;  %p505_p8 = pneg %p660_p13 }
  0x23   : > { %p504_p4 = scmp.ne.s32.totalorder %s672_s9, %s503_s13  ;;  %s508_s19 = scalar_lea.hbm %s752_s2, 512 }
  0x24   : > { %p509_p11 = scmp.lt.s32.totalorder %s672_s9, %s752_s2  ;;  %p510_p12 = scmp.lt.s32.totalorder %s508_s19, %s503_s13 }
  0x25   : > { %p506_p9 = pnand %p505_p8, %p504_p4 }
  0x26   : > { %p511_p0 = por %p510_p12, %p509_p11 }
  0x27   : > { %p507_p10 = pneg %p506_p9 }
  0x29   : > { %p512_p1 = pnand %p511_p0, %p507_p10 }
  0x2b   : > { %515 = shalt.err (!%p512_p1)
}
  0x2c   : > { %s516_s25 = scalar_lea.vmem %s674_s11, 256  ;;  %s572_s26 = smov [#allocation6]  }
  0x2d   : > { %p517_p2 = scmp.ne.s32.totalorder %s674_s11, %s516_s25  ;;  %s521_s27 = sshll.u32 %s572_s26, 4  ;;  %s522_s27 = int_to_ptr.vmem [resolvable:$false] %s521_s27 }
  0x2e   : > { %s523_s28 = scalar_lea.vmem %s522_s27, 512  ;;  %p524_p7 = scmp.lt.s32.totalorder %s674_s11, %s522_s27 }
  0x2f   : > { %p519_p3 = pnand %p517_p2, %p505_p8  ;;  %p525_p4 = scmp.lt.s32.totalorder %s523_s28, %s516_s25 }
  0x31   : > { %p520_p6 = pneg %p519_p3  ;;  %p526_p9 = por %p525_p4, %p524_p7 }
  0x33   : > { %p527_p5 = pnand %p526_p9, %p520_p6 }
  0x35   : > { %530 = shalt.err (!%p527_p5)
}
  0x36   : > { %s573_s30 = smov 128   ;;  %s574_s4 = smov 8  }
  0x37   : > { %447 = dma.hbm_to_vmem [thread:$0]  (!%p660_p13), %s672_s9, 256, %s674_s11, %s676_s12, %s573_s30, %s573_s30, %s574_s4  }
  0x38   : > { %p761_p8 = scmp.ne.s32.totalorder %s758_s23, 0 }
  0x39   : > { %p762_p10 = scmp.eq.s32.totalorder (!%p761_p8), %s619_s1, 0 }
  0x3a   : > { %167 = sbr.rel (%p761_p8) target bundleno = 222 (0xde), region = 32 }
  0x3f   : > { %548 = dma.done.wait (%p762_p10), [#allocation5], 16   ;;  %p763_p11 = pmov %p762_p10 }
  0x40   : > { %s173_s5 = sand.u32 1, %s561_s15   ;;  %p764_p5 = scmp.ne.s32.totalorder %s757_s22, 0 }
  0x41   : > { %550 = vsyncadd (%p763_p11), [#allocation5], 4294967280  ;;  %s419_s6 = sshll.u32 %s173_s5, 4  ;;  %s174_s7 = scalar_lea.sflag [#allocation4], %s173_s5 }
  0x42   : > { %s177_s8 = scalar_lea.vmem [#allocation6], %s419_s6 }
  0x43   : > { %552 = dma.done.wait (%p764_p5), %s174_s7, 256  }
  0x44   : > { %554 = vsyncadd (%p764_p5), %s174_s7, 4294967040 }
  0x45   : > { %182 = sfence }
  0x46   : > { %s429_s23 = sld [smem:[#allocation3 + $0x8]]  ;;  %v708_v0 = vld [vmem:[%s177_s8] sm:$0xff]  ;;  %v710_v1 = vld [vmem:[%s177_s8 + $0x8] sm:$0xff]  ;;  %s575_s11 = smov 126   ;;  %vm310_vm0 = vcmask 1046528   ;;  %vm329_vm1 = vcmask 111616  }
  0x47   : > { %s428_s29 = sld [smem:[#allocation3 + $0x7]]  ;;  %s576_s22 = smov 127   ;;  %vm327_vm2 = vcmask 113664  }
  0x48   : > { %s425_s9 = sld [smem:[#allocation3 + $0x4]]  ;;  %p201_p13 = scmp.lt.s32.totalorder %s619_s1, 1 }
  0x49   : > { %s426_s10 = sld [smem:[#allocation3 + $0x5]] }
  0x4a   : > { %s422_s12 = sld [smem:[#allocation3 + $0x1]]  ;;  %s770_s1 = smov (!%p201_p13, %s619_s1), 1 }
  0x4b   : > { %s423_s13 = sld [smem:[#allocation3 + $0x2]]  ;;  %s433_s24 = sshll.u32 %s770_s1, 4 }
  0x4c   : > { %v291_v2 = vstv %s429_s23  ;;  %s427_s14 = sld [smem:[#allocation3 + $0x6]]  ;;  %s205_s27 = scalar_lea.vmem %s753_s3, %s433_s24 }
  0x4d   : > { %v292_v3 = vmul.f32 %v291_v2, %v708_v0  ;;  %v278_v4 = vstv %s428_s29  ;;  %v293_v6 = vmul.f32 %v291_v2, %v710_v1  ;;  %s424_s17 = sld [smem:[#allocation3 + $0x3]] }
  0x4e   : > { %v279_v5 = vmul.f32 %v278_v4, %v708_v0  ;;  %v280_v7 = vmul.f32 %v278_v4, %v710_v1  ;;  %v249_v8 = vstv %s425_s9  ;;  %s206_s19 = sld [smem:[#allocation3]] }
  0x4f   : > { %296 = vrot.lane.b32.xlu1 %v292_v3, %s575_s11  ;;  %v251_v9 = vmul.f32 %v249_v8, %v710_v1  ;;  %v250_v10 = vmul.f32 %v249_v8, %v708_v0  ;;  %v262_v11 = vstv %s426_s10  ;;  %s304_s20 = sld [smem:[#allocation2]] }
  0x50   : > { %283 = vrot.lane.b32.xlu0 %v279_v5, %s576_s22  ;;  %v264_v12 = vmul.f32 %v262_v11, %v710_v1  ;;  %v263_v13 = vmul.f32 %v262_v11, %v708_v0  ;;  %v220_v14 = vstv %s422_s12 }
  0x51   : > { %v222_v15 = vmul.f32 %v220_v14, %v710_v1  ;;  %v221_v16 = vmul.f32 %v220_v14, %v708_v0  ;;  %v233_v17 = vstv %s423_s13 }
  0x52   : > { %v235_v18 = vmul.f32 %v233_v17, %v710_v1  ;;  %v234_v19 = vmul.f32 %v233_v17, %v708_v0  ;;  %v275_v20 = vstv %s427_s14 }
  0x53   : > { %298 = vrot.lane.b32.xlu1 %v293_v6, %s575_s11  ;;  %v276_v21 = vmul.f32 %v275_v20, %v708_v0  ;;  %v277_v25 = vmul.f32 %v275_v20, %v710_v1  ;;  %v246_v27 = vstv %s424_s17 }
  0x54   : > { %285 = vrot.lane.b32.xlu0 %v280_v7, %s576_s22  ;;  %v248_v31 = vmul.f32 %v246_v27, %v710_v1  ;;  %v247_v34 = vmul.f32 %v246_v27, %v708_v0  ;;  %v217_v42 = vstv %s206_s19 }
  0x55   : > { %v219_v47 = vmul.f32 %v217_v42, %v710_v1  ;;  %v218_v50 = vmul.f32 %v217_v42, %v708_v0  ;;  %v305_v56 = vstv %s304_s20 }
  0x57   : > { %256 = vrot.lane.b32.xlu1 %v251_v9, %s576_s22 }
  0x58   : > { %254 = vrot.lane.b32.xlu0 %v250_v10, %s576_s22 }
  0x5b   : > { %269 = vrot.lane.b32.xlu1 %v264_v12, %s575_s11 }
  0x5c   : > { %267 = vrot.lane.b32.xlu0 %v263_v13, %s575_s11 }
  0x5f   : > { %227 = vrot.lane.b32.xlu1 %v222_v15, %s576_s22 }
  0x60   : > { %225 = vrot.lane.b32.xlu0 %v221_v16, %s576_s22 }
  0x63   : > { %240 = vrot.lane.b32.xlu1 %v235_v18, %s575_s11 }
  0x64   : > { %238 = vrot.lane.b32.xlu0 %v234_v19, %s575_s11 }
  0xc1   : > { %v297_v22 = vpop.permute.xlu1 %296 }
  0xc2   : > { %v284_v23 = vpop.permute.xlu0 %283 }
  0xc3   : > { %v289_v24 = vadd.f32 %v284_v23, %v276_v21 }
  0xc5   : > { %v299_v26 = vpop.permute.xlu1 %298  ;;  %v302_v29 = vadd.f32 %v297_v22, %v289_v24 }
  0xc6   : > { %v286_v28 = vpop.permute.xlu0 %285 }
  0xc7   : > { %v290_v30 = vadd.f32 %v286_v28, %v277_v25  ;;  %v311_v36 = vrot.slane %v302_v29, 1 }
  0xc9   : > { %v303_v32 = vadd.f32 %v299_v26, %v290_v30  ;;  %v257_v33 = vpop.permute.xlu1 %256 }
  0xca   : > { %v255_v35 = vpop.permute.xlu0 %254  ;;  %v261_v38 = vadd.f32 %v257_v33, %v248_v31 }
  0xcb   : > { %v312_v37 = vrot.slane %v303_v32, 1  ;;  %v260_v39 = vadd.f32 %v255_v35, %v247_v34 }
  0xcd   : > { %v270_v40 = vpop.permute.xlu1 %269  ;;  %v313_v41 = vsel %vm310_vm0, %v311_v36, %v312_v37 }
  0xce   : > { %v274_v43 = vadd.f32 %v270_v40, %v261_v38  ;;  %v268_v44 = vpop.permute.xlu0 %267 }
  0xcf   : > { %v273_v45 = vadd.f32 %v268_v44, %v260_v39 }
  0xd0   : > { %v317_v46 = vadd.f32 %v312_v37, %v274_v43 }
  0xd1   : > { %v316_v48 = vadd.f32 %v313_v41, %v273_v45  ;;  %v228_v49 = vpop.permute.xlu1 %227 }
  0xd2   : > { %v321_v51 = vrot.slane %v317_v46, 1  ;;  %v226_v52 = vpop.permute.xlu0 %225  ;;  %v232_v54 = vadd.f32 %v228_v49, %v219_v47 }
  0xd3   : > { %v320_v53 = vrot.slane %v316_v48, 1  ;;  %v231_v55 = vadd.f32 %v226_v52, %v218_v50 }
  0xd5   : > { %v241_v57 = vpop.permute.xlu1 %240  ;;  %v322_v58 = vsel %vm310_vm0, %v320_v53, %v321_v51 }
  0xd6   : > { %v245_v59 = vadd.f32 %v241_v57, %v232_v54  ;;  %v239_v60 = vpop.permute.xlu0 %238 }
  0xd7   : > { %v244_v61 = vadd.f32 %v239_v60, %v231_v55 }
  0xd8   : > { %v307_v62 = vadd.f32 %v305_v56, %v245_v59 }
  0xd9   : > { %v306_v63 = vadd.f32 %v305_v56, %v244_v61 }
  0xda   : > { %v326_v0 = vadd.f32 %v321_v51, %v307_v62 }
  0xdb   : > { %v325_v1 = vadd.f32 %v322_v58, %v306_v63 }
  0xdc   : > { %330 = vst.msk [vmem:[%s205_s27 + $0x8] sm:$0x3f] %vm329_vm1, %v326_v0 }
  0xdd   : > { %328 = vst.msk [vmem:[%s205_s27] sm:$0xff] %vm327_vm2, %v325_v1 }
  0xde PF: > { %p15_p12 = scmp.ge.s32.totalorder %s622_s18, 4   ;;  %s765_s14 = smov %s561_s15 }
  0xdf   : > { %s766_s15 = smov %s565_s16  ;;  %s767_s16 = smov %s632_s21 }
  0xe0   : > { %s768_s17 = smov %s622_s18  ;;  %17 = sbr.rel (!%p15_p12) target bundleno = 6 (0x6), region = 77 }
  0xe5   :  { %352 = vsyncpa [#allocation4], 1 }
  0xe6   :  { %354 = vsyncpa [#allocation4 + $0x1], 1 }
  0xe7   :  { %355 = vsyncpa [#allocation5], 1 }
  0xe8   :  { %357 = vsyncpa [#allocation5 + $0x1], 1 }

</bundles_post_ra>
